<compile_context>
chip_gen: v6e
topology: v6e:2x2x1
jax: 0.10.0
libtpu: 0.0.40
codegen_flags: <defaults>
</compile_context>

<pallas_src>
import functools

import jax
import jax.numpy as jnp
from jax.experimental import pallas as pl
from jax.experimental.pallas import tpu as pltpu


def mlp_kernel(x_ref, w1_ref, b1_ref, w2_ref, b2_ref,
               w3_ref, b3_ref, w4_ref, b4_ref, o_ref):
    # Chained matmuls on the MXU (f32 accumulation), tanh on the EUP, bias adds on
    # the VPU.  Activations are re-cast to the weight dtype before each dot so bf16
    # weights keep the MXU in bf16 mode, while tanh/bias stay in f32 (v5e has no
    # bf16 VPU/EUP).
    x = x_ref[...]
    h = jnp.tanh(
        jnp.dot(x, w1_ref[...], preferred_element_type=jnp.float32) + b1_ref[...]
    )
    h = jnp.tanh(
        jnp.dot(h.astype(w2_ref.dtype), w2_ref[...],
                preferred_element_type=jnp.float32) + b2_ref[...]
    )
    h = jnp.tanh(
        jnp.dot(h.astype(w3_ref.dtype), w3_ref[...],
                preferred_element_type=jnp.float32) + b3_ref[...]
    )
    out = (jnp.dot(h.astype(w4_ref.dtype), w4_ref[...],
                   preferred_element_type=jnp.float32) + b4_ref[...])
    o_ref[...] = out.astype(o_ref.dtype)  # (tb, out_features) store, no lane padding


def prepare_params(params, compute_dtype=jnp.float32):
    """Hoist weight casts out of the per-forward path.  Biases stay f32."""
    return {
        "w1": params["w1"].astype(compute_dtype), "b1": params["b1"],
        "w2": params["w2"].astype(compute_dtype), "b2": params["b2"],
        "w3": params["w3"].astype(compute_dtype), "b3": params["b3"],
        "w4": params["w4"].astype(compute_dtype), "b4": params["b4"],
    }


@functools.partial(jax.jit, static_argnames=("batch_tile",))
def net_forward(x, params, batch_tile=8192):
    """x: [batch, in_features]; params: dict from prepare_params / init_params."""
    batch, in_features = x.shape
    n_units = params["w1"].shape[1]
    out_features = params["w4"].shape[1]
    compute_dtype = params["w1"].dtype

    # --- batch tiling: multiple of 8 sublanes ----------------------------------
    tb = min(int(batch_tile), batch)
    tb = max(8, ((tb + 7) // 8) * 8)
    # Keep >=2 grid steps so both v7x TensorCores get work (no-op on v5e/v6e).
    if -(-batch // tb) < 2 and batch > 8:
        tb = max(8, ((-(-batch // 2) + 7) // 8) * 8)
    padded_batch = -(-batch // tb) * tb
    if padded_batch != batch:
        x = jnp.pad(x, ((0, padded_batch - batch), (0, 0)))
    grid = (padded_batch // tb,)

    # Cast the streamed input only if the (pre-cast) weights are narrower than f32.
    # TODO(synk): for bf16 production use, cast x at the upstream producer (or use
    # allow_input_fusion) so the cast does not cost a separate HBM pass here.
    xq = x if x.dtype == compute_dtype else x.astype(compute_dtype)

    w1, b1 = params["w1"], params["b1"]
    w2, b2 = params["w2"], params["b2"]
    w3, b3 = params["w3"], params["b3"]
    w4, b4 = params["w4"], params["b4"]

    def const2d(arr):  # whole-array block, VMEM-resident across all batch tiles
        return pl.BlockSpec(arr.shape, lambda i: (0, 0))

    in_specs = [
        pl.BlockSpec((tb, in_features), lambda i: (i, 0)),  # streamed batch tile
        const2d(w1), const2d(b1),
        const2d(w2), const2d(b2),
        const2d(w3), const2d(b3),
        const2d(w4), const2d(b4),
    ]
    # Output block's last dim equals the full array dim (legal) -> no 128-lane pad
    # in HBM and no wrapper slice over a padded array.
    out_specs = pl.BlockSpec((tb, out_features), lambda i: (i, 0))

    itemsize = jnp.dtype(compute_dtype).itemsize
    weight_bytes = sum(int(params[k].size) * params[k].dtype.itemsize
                       for k in ("w1", "w2", "w3", "w4", "b1", "b2", "b3", "b4"))
    cost = pl.CostEstimate(
        flops=2 * padded_batch * (in_features * n_units
                                  + 2 * n_units * n_units
                                  + n_units * out_features),
        transcendentals=3 * n_units * padded_batch,
        bytes_accessed=padded_batch * (in_features * itemsize + out_features * 4)
                       + weight_bytes,
    )

    y_padded = pl.pallas_call(
        mlp_kernel,
        grid=grid,
        in_specs=in_specs,
        out_specs=out_specs,
        out_shape=jax.ShapeDtypeStruct((padded_batch, out_features), jnp.float32),
        compiler_params=pltpu.CompilerParams(
            dimension_semantics=("parallel",),   # shard batch tiles across TCs (v7x)
            # Lane-padded VMEM math at tb=8192: x 2x4MB + out 2x4MB (f32) + two live
            # (tb,30) activations ~8MB  =>  ~24-28 MB; 48 MiB leaves headroom and
            # stays below v7x's 64 MiB physical VMEM.
            vmem_limit_bytes=48 * 1024 * 1024,
        ),
        cost_estimate=cost,
    )(xq, w1, b1, w2, b2, w3, b3, w4, b4)

    if padded_batch != batch:
        y_padded = y_padded[:batch]
    return y_padded


def init_params(key, in_features=10, n_units=30, out_features=2):
    """Deterministic Xavier-normal weight init (matches shapes of the PyTorch module)."""
    def xavier(k, fan_in, fan_out):
        std = (2.0 / (fan_in + fan_out)) ** 0.5
        return std * jax.random.normal(k, (fan_in, fan_out), dtype=jnp.float32)

    k1, k2, k3, k4 = jax.random.split(key, 4)
    return {
        "w1": xavier(k1, in_features, n_units),
        "b1": jnp.zeros((1, n_units), jnp.float32),
        "w2": xavier(k2, n_units, n_units),
        "b2": jnp.zeros((1, n_units), jnp.float32),
        "w3": xavier(k3, n_units, n_units),
        "b3": jnp.zeros((1, n_units), jnp.float32),
        "w4": xavier(k4, n_units, out_features),
        "b4": jnp.zeros((1, out_features), jnp.float32),
    }


if __name__ == "__main__":
    key = jax.random.PRNGKey(0)
    kx, kp = jax.random.split(key)

    batch, in_features, n_units, out_features = 64, 10, 30, 2
    x = jax.random.normal(kx, (batch, in_features), dtype=jnp.float32)
    params = prepare_params(init_params(kp, in_features, n_units, out_features),
                            compute_dtype=jnp.float32)  # f32 demo: tight ref check

    # small batch_tile so the demo exercises the multi-step batch grid (grid=(4,))
    y = net_forward(x, params, batch_tile=16)
    jax.block_until_ready(y)

    # pure-JAX reference check
    def ref(x, p):
        h = jnp.tanh(x @ p["w1"] + p["b1"])
        h = jnp.tanh(h @ p["w2"] + p["b2"])
        h = jnp.tanh(h @ p["w3"] + p["b3"])
        return h @ p["w4"] + p["b4"]

    y_ref = ref(x, params)
    assert y.shape == (batch, out_features)
    assert jnp.allclose(y, y_ref, atol=1e-5, rtol=1e-5)

    print("KERNEL_OK")
</pallas_src>

<mosaic_0001>
module attributes {stable_mosaic.version = 11 : i64} {
  func.func @mlp_kernel(%arg0: i32, %arg1: memref<16x10xf32, #tpu.memory_space<vmem>>, %arg2: memref<10x30xf32, #tpu.memory_space<vmem>>, %arg3: memref<1x30xf32, #tpu.memory_space<vmem>>, %arg4: memref<30x30xf32, #tpu.memory_space<vmem>>, %arg5: memref<1x30xf32, #tpu.memory_space<vmem>>, %arg6: memref<30x30xf32, #tpu.memory_space<vmem>>, %arg7: memref<1x30xf32, #tpu.memory_space<vmem>>, %arg8: memref<30x2xf32, #tpu.memory_space<vmem>>, %arg9: memref<1x2xf32, #tpu.memory_space<vmem>>, %arg10: memref<16x2xf32, #tpu.memory_space<vmem>>) attributes {dimension_semantics = [#tpu.dimension_semantics<parallel>], iteration_bounds = array<i64: 4>, scalar_prefetch = 0 : i64, scratch_operands = 0 : i64, tpu.core_type = #tpu.core_type<tc>, window_params = [{transform_indices = @transform_0, window_bounds = array<i64: 16, 10>}, {pipeline_mode = #tpu.pipeline_mode<synchronous>, transform_indices = @transform_1, window_bounds = array<i64: 10, 30>}, {pipeline_mode = #tpu.pipeline_mode<synchronous>, transform_indices = @transform_2, window_bounds = array<i64: 1, 30>}, {pipeline_mode = #tpu.pipeline_mode<synchronous>, transform_indices = @transform_3, window_bounds = array<i64: 30, 30>}, {pipeline_mode = #tpu.pipeline_mode<synchronous>, transform_indices = @transform_4, window_bounds = array<i64: 1, 30>}, {pipeline_mode = #tpu.pipeline_mode<synchronous>, transform_indices = @transform_5, window_bounds = array<i64: 30, 30>}, {pipeline_mode = #tpu.pipeline_mode<synchronous>, transform_indices = @transform_6, window_bounds = array<i64: 1, 30>}, {pipeline_mode = #tpu.pipeline_mode<synchronous>, transform_indices = @transform_7, window_bounds = array<i64: 30, 2>}, {pipeline_mode = #tpu.pipeline_mode<synchronous>, transform_indices = @transform_8, window_bounds = array<i64: 1, 2>}, {transform_indices = @transform_9, window_bounds = array<i64: 16, 2>}]} {
    %c0 = arith.constant 0 : index
    %c0_0 = arith.constant 0 : index
    %0 = vector.load %arg1[%c0, %c0_0] : memref<16x10xf32, #tpu.memory_space<vmem>>, vector<16x10xf32>
    %c0_1 = arith.constant 0 : index
    %c0_2 = arith.constant 0 : index
    %1 = vector.load %arg2[%c0_1, %c0_2] : memref<10x30xf32, #tpu.memory_space<vmem>>, vector<10x30xf32>
    %cst = arith.constant dense<0.000000e+00> : vector<16x30xf32>
    %2 = tpu.matmul %0, %1, %cst {dimension_numbers = #tpu.dot_dimension_numbers<[1], [0], [0], [1], [0, 0, 1, 1], [], []>} : vector<16x10xf32>, vector<10x30xf32>, vector<16x30xf32> -> vector<16x30xf32>
    %c0_3 = arith.constant 0 : index
    %c0_4 = arith.constant 0 : index
    %3 = vector.load %arg3[%c0_3, %c0_4] : memref<1x30xf32, #tpu.memory_space<vmem>>, vector<1x30xf32>
    %4 = vector.broadcast %3 : vector<1x30xf32> to vector<16x30xf32>
    %5 = arith.addf %2, %4 : vector<16x30xf32>
    %6 = math.tanh %5 : vector<16x30xf32>
    %c0_5 = arith.constant 0 : index
    %c0_6 = arith.constant 0 : index
    %7 = vector.load %arg4[%c0_5, %c0_6] : memref<30x30xf32, #tpu.memory_space<vmem>>, vector<30x30xf32>
    %cst_7 = arith.constant dense<0.000000e+00> : vector<16x30xf32>
    %8 = tpu.matmul %6, %7, %cst_7 {dimension_numbers = #tpu.dot_dimension_numbers<[1], [0], [0], [1], [0, 0, 1, 1], [], []>} : vector<16x30xf32>, vector<30x30xf32>, vector<16x30xf32> -> vector<16x30xf32>
    %c0_8 = arith.constant 0 : index
    %c0_9 = arith.constant 0 : index
    %9 = vector.load %arg5[%c0_8, %c0_9] : memref<1x30xf32, #tpu.memory_space<vmem>>, vector<1x30xf32>
    %10 = vector.broadcast %9 : vector<1x30xf32> to vector<16x30xf32>
    %11 = arith.addf %8, %10 : vector<16x30xf32>
    %12 = math.tanh %11 : vector<16x30xf32>
    %c0_10 = arith.constant 0 : index
    %c0_11 = arith.constant 0 : index
    %13 = vector.load %arg6[%c0_10, %c0_11] : memref<30x30xf32, #tpu.memory_space<vmem>>, vector<30x30xf32>
    %cst_12 = arith.constant dense<0.000000e+00> : vector<16x30xf32>
    %14 = tpu.matmul %12, %13, %cst_12 {dimension_numbers = #tpu.dot_dimension_numbers<[1], [0], [0], [1], [0, 0, 1, 1], [], []>} : vector<16x30xf32>, vector<30x30xf32>, vector<16x30xf32> -> vector<16x30xf32>
    %c0_13 = arith.constant 0 : index
    %c0_14 = arith.constant 0 : index
    %15 = vector.load %arg7[%c0_13, %c0_14] : memref<1x30xf32, #tpu.memory_space<vmem>>, vector<1x30xf32>
    %16 = vector.broadcast %15 : vector<1x30xf32> to vector<16x30xf32>
    %17 = arith.addf %14, %16 : vector<16x30xf32>
    %18 = math.tanh %17 : vector<16x30xf32>
    %c0_15 = arith.constant 0 : index
    %c0_16 = arith.constant 0 : index
    %19 = vector.load %arg8[%c0_15, %c0_16] : memref<30x2xf32, #tpu.memory_space<vmem>>, vector<30x2xf32>
    %cst_17 = arith.constant dense<0.000000e+00> : vector<16x2xf32>
    %20 = tpu.matmul %18, %19, %cst_17 {dimension_numbers = #tpu.dot_dimension_numbers<[1], [0], [0], [1], [0, 0, 1, 1], [], []>} : vector<16x30xf32>, vector<30x2xf32>, vector<16x2xf32> -> vector<16x2xf32>
    %c0_18 = arith.constant 0 : index
    %c0_19 = arith.constant 0 : index
    %21 = vector.load %arg9[%c0_18, %c0_19] : memref<1x2xf32, #tpu.memory_space<vmem>>, vector<1x2xf32>
    %22 = vector.broadcast %21 : vector<1x2xf32> to vector<16x2xf32>
    %23 = arith.addf %20, %22 : vector<16x2xf32>
    %c0_20 = arith.constant 0 : index
    %c0_21 = arith.constant 0 : index
    %24 = vector.load %arg10[%c0_20, %c0_21] : memref<16x2xf32, #tpu.memory_space<vmem>>, vector<16x2xf32>
    tpu.vector_store %arg10[%c0_20, %c0_21], %23 {strides = array<i32>} : memref<16x2xf32, #tpu.memory_space<vmem>>, vector<16x2xf32>,
    return
  }
  func.func @transform_0(%arg0: i32) -> (i32, i32) {
    %c0_i32 = arith.constant 0 : i32
    %c0_i32_0 = arith.constant 0 : i32
    return %arg0, %c0_i32 : i32, i32
  }
  func.func @transform_1(%arg0: i32) -> (i32, i32) {
    %c0_i32 = arith.constant 0 : i32
    %c0_i32_0 = arith.constant 0 : i32
    %c0_i32_1 = arith.constant 0 : i32
    return %c0_i32, %c0_i32_0 : i32, i32
  }
  func.func @transform_2(%arg0: i32) -> (i32, i32) {
    %c0_i32 = arith.constant 0 : i32
    %c0_i32_0 = arith.constant 0 : i32
    %c0_i32_1 = arith.constant 0 : i32
    return %c0_i32, %c0_i32_0 : i32, i32
  }
  func.func @transform_3(%arg0: i32) -> (i32, i32) {
    %c0_i32 = arith.constant 0 : i32
    %c0_i32_0 = arith.constant 0 : i32
    %c0_i32_1 = arith.constant 0 : i32
    return %c0_i32, %c0_i32_0 : i32, i32
  }
  func.func @transform_4(%arg0: i32) -> (i32, i32) {
    %c0_i32 = arith.constant 0 : i32
    %c0_i32_0 = arith.constant 0 : i32
    %c0_i32_1 = arith.constant 0 : i32
    return %c0_i32, %c0_i32_0 : i32, i32
  }
  func.func @transform_5(%arg0: i32) -> (i32, i32) {
    %c0_i32 = arith.constant 0 : i32
    %c0_i32_0 = arith.constant 0 : i32
    %c0_i32_1 = arith.constant 0 : i32
    return %c0_i32, %c0_i32_0 : i32, i32
  }
  func.func @transform_6(%arg0: i32) -> (i32, i32) {
    %c0_i32 = arith.constant 0 : i32
    %c0_i32_0 = arith.constant 0 : i32
    %c0_i32_1 = arith.constant 0 : i32
    return %c0_i32, %c0_i32_0 : i32, i32
  }
  func.func @transform_7(%arg0: i32) -> (i32, i32) {
    %c0_i32 = arith.constant 0 : i32
    %c0_i32_0 = arith.constant 0 : i32
    %c0_i32_1 = arith.constant 0 : i32
    return %c0_i32, %c0_i32_0 : i32, i32
  }
  func.func @transform_8(%arg0: i32) -> (i32, i32) {
    %c0_i32 = arith.constant 0 : i32
    %c0_i32_0 = arith.constant 0 : i32
    %c0_i32_1 = arith.constant 0 : i32
    return %c0_i32, %c0_i32_0 : i32, i32
  }
  func.func @transform_9(%arg0: i32) -> (i32, i32) {
    %c0_i32 = arith.constant 0 : i32
    %c0_i32_0 = arith.constant 0 : i32
    return %arg0, %c0_i32 : i32, i32
  }
}

</mosaic_0001>

<bundles_post_ra>
// kernel: net_forward.1
= control target key start
LH: loop header
LB: loop body
LE: loop exit
PB: predicated region body
PF: predicated region fallthrough
CT: control target
= control target key end

     0   :  { %s952_s30 = smov 0   ;;  %s1042_s0 = inlined_call_operand.vmem [shape: f32[64,10], index: 0, kind: input, shape index: {}]   ;;  %s1043_s1 = inlined_call_operand.vmem [shape: f32[10,30], index: 1, kind: input, shape index: {}]   ;;  %s1044_s2 = inlined_call_operand.vmem [shape: f32[1,30], index: 2, kind: input, shape index: {}]   ;;  %s1045_s3 = inlined_call_operand.vmem [shape: f32[30,30], index: 3, kind: input, shape index: {}]   ;;  %s1046_s4 = inlined_call_operand.vmem [shape: f32[1,30], index: 4, kind: input, shape index: {}]   ;;  %s1047_s5 = inlined_call_operand.vmem [shape: f32[30,30], index: 5, kind: input, shape index: {}]   ;;  %s1048_s6 = inlined_call_operand.vmem [shape: f32[1,30], index: 6, kind: input, shape index: {}]   ;;  %s1049_s7 = inlined_call_operand.vmem [shape: f32[30,2], index: 7, kind: input, shape index: {}]   ;;  %s1050_s8 = inlined_call_operand.vmem [shape: f32[1,2], index: 8, kind: input, shape index: {}]   ;;  %s1051_s9 = inlined_call_operand.vmem [shape: f32[64,2], index: 9, kind: output, shape index: {}]  }
   0x1 LB: > { %s785_s10 = sadd.s32 4294967295, %s900_s30   ;;  %p789_p0 = scmp.ge.s32.totalorder %s900_s30, 1  ;;  %s900_s30 = sphi %s952_s30, %s19_s30  }
   0x2   : > { %p288_p1 = scmp.lt.s32.totalorder %s900_s30, 5 }
   0x4   : > { %p289_p2 = pnand %p789_p0, %p288_p1 }
   0x5   : > { %s790_s15 = sshll.u32 (!%p289_p2), %s785_s10, 1 }
   0x6   : > { %292 = sbr.rel (%p289_p2) target bundleno = 850 (0x352), region = 56  ;;  %p325_p3 = scmp.lt.s32.totalorder (!%p289_p2), %s790_s15, 7 }
   0xb   : > { %v339_v0 = vld [vmem:[%s1043_s1 + $0x8] sm:$0x3]  ;;  %vm354_vm0 = vcmask 1041408   ;;  %v338_v1 = vld [vmem:[%s1043_s1] sm:$0xff]  ;;  %s1053_s15 = smov (!%p325_p3, %s790_s15), 7  ;;  %vm347_vm1 = vcmask 80896  }
   0xc   : > { %834 = vmatprep.subr.msk.mxu0 %vm354_vm0, %v339_v0  ;;  %s791_s16 = sshll.u32 %s1053_s15, 3  ;;  %v438_v4 = vld [vmem:[%s1045_s3 + $0x18] sm:$0x3f]  ;;  %vm453_vm2 = vcmask 1045504   ;;  %v437_v5 = vld [vmem:[%s1045_s3 + $0x10] sm:$0xff]  ;;  %v436_v6 = vld [vmem:[%s1045_s3 + $0x8] sm:$0xff] }
   0xd   : > { %835 = vmatpush3.msk.msra.mxu0 %vm354_vm0, %v339_v0  ;;  %s328_s19 = scalar_lea.vmem %s1042_s0, %s791_s16  ;;  %841 = vmatprep.subr.msk.mxu1 %vm453_vm2, %v438_v4  ;;  %v435_v7 = vld [vmem:[%s1045_s3] sm:$0xff]  ;;  %vm446_vm3 = vcmask 244736   ;;  %v537_v15 = vld [vmem:[%s1047_s5 + $0x18] sm:$0x3f]  ;;  %v536_v16 = vld [vmem:[%s1047_s5 + $0x10] sm:$0xff]  ;;  %s334_s18 = scalar_lea.vmem %s1051_s9, %s791_s16  ;;  %vm726_vm4 = vcmask 15360  }
   0xe   : > { %836 = vmatprep.subr.mxu0 %v338_v1  ;;  %v336_v2 = vld [vmem:[%s328_s19] sm:$0xff]  ;;  %v337_v3 = vld [vmem:[%s328_s19 + $0x8] sm:$0xff]  ;;  %842 = vmatpush3.msk.msra.mxu1 %vm453_vm2, %v438_v4  ;;  %v634_v26 = vld [vmem:[%s1049_s7 + $0x18] sm:$0x3f] }
   0xf   : > { %837 = vmatpush3.msra.mxu0 %v338_v1  ;;  %838 = vmatprep.mubr.msk.f32.mxu0 %vm347_vm1, %v336_v2  ;;  %v794_v8 = vld [vmem:[%s1044_s2] ss:$0 sm:$0xff]  ;;  %v535_v17 = vld [vmem:[%s1047_s5 + $0x8] sm:$0xff]  ;;  %v633_v27 = vld [vmem:[%s1049_s7 + $0x10] sm:$0xff] }
  0x10   : > { %839 = vmatmul.mubr.msk.f32.vlgmr.msra.gmra.mxu0 %vm347_vm1, %v337_v3  ;;  %843 = vmatprep.subr.mxu1 %v437_v5  ;;  %v534_v18 = vld [vmem:[%s1047_s5] sm:$0xff]  ;;  %v632_v28 = vld [vmem:[%s1049_s7 + $0x8] sm:$0xff] }
  0x11   : > { %844 = vmatpush3.msra.mxu1 %v437_v5  ;;  %852 = vmatprep.subr.msk.mxu0 %vm453_vm2, %v537_v15  ;;  %v798_v19 = vld [vmem:[%s1046_s4] ss:$0 sm:$0xff] }
  0x12   : > { %845 = vmatprep.subr.mxu1 %v436_v6  ;;  %853 = vmatpush3.msk.msra.mxu0 %vm453_vm2, %v537_v15  ;;  %v631_v29 = vld [vmem:[%s1049_s7] sm:$0xff] }
  0x13   : > { %846 = vmatpush3.msra.mxu1 %v436_v6  ;;  %854 = vmatprep.subr.mxu0 %v536_v16  ;;  %v802_v30 = vld [vmem:[%s1048_s6] ss:$0 sm:$0xff] }
  0x14   : > { %847 = vmatprep.subr.mxu1 %v435_v7  ;;  %855 = vmatpush3.msra.mxu0 %v536_v16  ;;  %v806_v38 = vld [vmem:[%s1050_s8] ss:$0 sm:$0xff] }
  0x15   : > { %848 = vmatpush3.msra.mxu1 %v435_v7  ;;  %856 = vmatprep.subr.mxu0 %v535_v17 }
  0x16   : > { %857 = vmatpush3.msra.mxu0 %v535_v17  ;;  %863 = vmatprep.subr.msk.mxu1 %vm453_vm2, %v634_v26 }
  0x17   : > { %858 = vmatprep.subr.mxu0 %v534_v18 }
  0x18   : > { %859 = vmatpush3.msra.mxu0 %v534_v18 }
  0xd0   : > { %v840_v9 = vpop.f32.mrf.mxu0 }
  0xd1   : > { %v430_v10 = vadd.f32 %v840_v9, %v794_v8 }
  0xd2   : > { %v424_v11 = vpop.f32.mrf.mxu0 }
  0xd3   : > { %v425_v12 = vadd.f32 %v794_v8, %v424_v11 }
  0xd5   : > { %882 = vtanh.f32 %v425_v12 }
  0xd6   : > { %884 = vtanh.f32 %v430_v10 }
  0xe2   : > { %v883_v13 = vpop.eup %882 }
  0xe3   : > { %v885_v14 = vpop.eup %884  ;;  %849 = vmatprep.mubr.msk.f32.mxu1 %vm446_vm3, %v883_v13 }
  0xe4   : > { %850 = vmatmul.mubr.msk.f32.vlgmr.msra.gmra.mxu1 %vm446_vm3, %v885_v14 }
  0xe5   : > { %864 = vmatpush3.msk.msra.mxu1 %vm453_vm2, %v634_v26 }
  0xe6   : > { %865 = vmatprep.subr.mxu1 %v633_v27 }
  0xe7   : > { %866 = vmatpush3.msra.mxu1 %v633_v27 }
  0xe8   : > { %867 = vmatprep.subr.mxu1 %v632_v28 }
  0xe9   : > { %868 = vmatpush3.msra.mxu1 %v632_v28 }
  0xea   : > { %869 = vmatprep.subr.mxu1 %v631_v29 }
  0xeb   : > { %870 = vmatpush3.msra.mxu1 %v631_v29 }
 0x1a4   : > { %v851_v20 = vpop.f32.mrf.mxu1 }
 0x1a5   : > { %v529_v21 = vadd.f32 %v851_v20, %v798_v19 }
 0x1a6   : > { %v523_v22 = vpop.f32.mrf.mxu1 }
 0x1a7   : > { %v524_v23 = vadd.f32 %v798_v19, %v523_v22 }
 0x1a9   : > { %886 = vtanh.f32 %v524_v23 }
 0x1aa   : > { %888 = vtanh.f32 %v529_v21 }
 0x1b6   : > { %v887_v24 = vpop.eup %886 }
 0x1b7   : > { %v889_v25 = vpop.eup %888  ;;  %860 = vmatprep.mubr.msk.f32.mxu0 %vm446_vm3, %v887_v24 }
 0x1b8   : > { %861 = vmatmul.mubr.msk.f32.vlgmr.msra.gmra.mxu0 %vm446_vm3, %v889_v25 }
 0x278   : > { %v862_v31 = vpop.f32.mrf.mxu0 }
 0x279   : > { %v626_v32 = vadd.f32 %v862_v31, %v802_v30 }
 0x27a   : > { %v620_v33 = vpop.f32.mrf.mxu0 }
 0x27b   : > { %v621_v34 = vadd.f32 %v802_v30, %v620_v33 }
 0x27d   : > { %890 = vtanh.f32 %v621_v34 }
 0x27e   : > { %892 = vtanh.f32 %v626_v32 }
 0x28a   : > { %v891_v35 = vpop.eup %890 }
 0x28b   : > { %v893_v36 = vpop.eup %892  ;;  %871 = vmatprep.mubr.msk.f32.mxu1 %vm446_vm3, %v891_v35 }
 0x28c   : > { %872 = vmatmul.mubr.msk.f32.vlgmr.msra.gmra.mxu1 %vm446_vm3, %v893_v36 }
 0x34c   : > { %v873_v37 = vpop.f32.mrf.mxu1 }
 0x34d   : > { %v723_v41 = vadd.f32 %v873_v37, %v806_v38 }
 0x34e   : > { %v717_v39 = vpop.f32.mrf.mxu1 }
 0x34f   : > { %v718_v40 = vadd.f32 %v806_v38, %v717_v39  ;;  %728 = vst.msk [vmem:[%s334_s18 + $0x8] sm:$0xff] %vm726_vm4, %v723_v41 }
 0x351   : > { %727 = vst.msk [vmem:[%s334_s18] sm:$0xff] %vm726_vm4, %v718_v40 }
 0x352 PF: > { %s19_s30 = sadd.s32 1, %s900_s30  }
 0x353   : > { %p16_p4 = scmp.ge.s32.totalorder %s19_s30, 6  }
 0x355   :  { %18 = sbr.rel (!%p16_p4) target bundleno = 1 (0x1), region = 86 }

</bundles_post_ra>
